<compile_context>
chip_gen: v7x
topology: tpu7x:2x2x1
jax: 0.10.0
libtpu: 0.0.40
codegen_flags: <defaults>
</compile_context>

<pallas_src>
import jax
import jax.numpy as jnp
from jax.experimental import pallas as pl
from jax.experimental.pallas import tpu as pltpu


def _round_up(x, m):
    return ((x + m - 1) // m) * m


def glu_pooling_kernel(x_ref, m_ref, o_ref, acc_ref):
    # x_ref:   (tB, tS, Fp)  features block                 (VMEM)
    # m_ref:   (tB, 1,  tS)  attention-mask block, lane-dense (VMEM)
    # o_ref:   (tB, 1,  Fp)  pooled output block            (VMEM)
    # acc_ref: (tB, 1,  Fp)  float32 accumulator            (VMEM scratch)
    si = pl.program_id(1)

    @pl.when(si == 0)
    def _():
        acc_ref[...] = jnp.zeros_like(acc_ref)

    # softmax over the size-1 score axis: finite -> exactly 1.0, masked(-inf)
    # -> NaN.  Folding in the subsequent "* score_mask":
    #   weight = where(mask == 0, NaN, mask)
    m = m_ref[...].astype(jnp.float32)                     # (tB, 1, tS)
    w = jnp.where(m == 0.0, jnp.float32(jnp.nan), m)       # (tB, 1, tS)
    w_col = jnp.transpose(w, (0, 2, 1))                    # (tB, tS, 1)

    x = x_ref[...].astype(jnp.float32)                     # (tB, tS, Fp)
    acc_ref[...] += jnp.sum(w_col * x, axis=1, keepdims=True)

    @pl.when(si == pl.num_programs(1) - 1)
    def _():
        o_ref[...] = acc_ref[...].astype(o_ref.dtype)


def glu_pooling(features, attention_mask, params=None, *,
                batch_block=8,
                x_vmem_budget_bytes=24 * 1024 * 1024,
                vmem_limit_bytes=64 * 1024 * 1024):
    """Pallas TPU forward of GLUPooling.

    `params` (W/bW/U/bU/V/bV) is accepted for interface parity but never read:
    the size-1 softmax makes the gated score path mathematically irrelevant to
    the output (1.0 for unmasked positions, NaN for masked ones).
    """
    del params  # output-irrelevant, see module docstring / header comment
    B, S, F = features.shape
    out_dtype = features.dtype
    itemsize = jnp.dtype(features.dtype).itemsize

    # Lane-dense feature / output width (no-op when F is already 128-aligned).
    Fp = _round_up(F, 128)

    # Batch rows per grid step; keep >= 2 steps on the "parallel" axis so a
    # v7x megacore never leaves a TensorCore idle, even for tiny batches.
    tB = max(1, min(batch_block, B // 2)) if B >= 2 else 1
    Bp = _round_up(B, tB)

    # Sequence tiling: double-buffered x blocks must fit the VMEM budget.
    max_ts = max(8, x_vmem_budget_bytes // (2 * tB * Fp * itemsize))
    if S <= max_ts:
        tS = S                                   # single sequence step
    else:
        tS = max(128, (max_ts // 128) * 128)     # lane/sublane aligned chunks
    Sp = _round_up(S, tS)

    # Wrapper-side padding: zeros for features, ones for the mask, so padded
    # positions contribute exactly 0 and never introduce spurious NaNs.
    if (Bp, Sp, Fp) != (B, S, F):
        features = jnp.pad(features, ((0, Bp - B), (0, Sp - S), (0, Fp - F)))
    mask = attention_mask.astype(jnp.float32)
    if (Bp, Sp) != (B, S):
        mask = jnp.pad(mask, ((0, Bp - B), (0, Sp - S)), constant_values=1.0)
    mask = mask.reshape(Bp, 1, Sp)               # lane-dense: S on the lanes

    grid = (Bp // tB, Sp // tS)
    out = pl.pallas_call(
        glu_pooling_kernel,
        out_shape=jax.ShapeDtypeStruct((Bp, 1, Fp), out_dtype),
        grid=grid,
        in_specs=[
            pl.BlockSpec((tB, tS, Fp), lambda b, s: (b, s, 0)),   # features
            pl.BlockSpec((tB, 1, tS), lambda b, s: (b, 0, s)),    # mask
        ],
        out_specs=pl.BlockSpec((tB, 1, Fp), lambda b, s: (b, 0, 0)),
        scratch_shapes=[pltpu.VMEM((tB, 1, Fp), jnp.float32)],
        compiler_params=pltpu.CompilerParams(
            dimension_semantics=("parallel", "arbitrary"),
            vmem_limit_bytes=vmem_limit_bytes),
    )(features, mask)
    return out[:B, 0, :F]


def glu_pooling_ref(features, attention_mask, params):
    # Pure-JAX reference mirroring the PyTorch forward literally (full path).
    gate = jax.nn.sigmoid(features @ params["W"] + params["bW"])
    attn = (features @ params["U"] + params["bU"]) * gate
    score = attn @ params["V"] + params["bV"]                     # (B, S, 1)
    score = jnp.where(attention_mask[..., None] == 0, -jnp.inf, score)
    mx = jnp.max(score, axis=-1, keepdims=True)                   # size-1 axis
    e = jnp.exp(score - mx)
    score = e / jnp.sum(e, axis=-1, keepdims=True)
    return jnp.sum(score * attention_mask[..., None] * features, axis=1)


if __name__ == "__main__":
    B, S, F, H = 2, 8, 32, 32   # batch, seq, in_features, hidden_dim
    key = jax.random.PRNGKey(0)
    kx, kw, kbw, ku, kbu, kv, kbv = jax.random.split(key, 7)

    features = jax.random.normal(kx, (B, S, F), dtype=jnp.float32)
    attention_mask = jnp.ones((B, S), dtype=jnp.float32)

    params = {
        "W":  jax.random.normal(kw,  (F, H), jnp.float32) * 0.1,
        "bW": jax.random.normal(kbw, (1, H), jnp.float32) * 0.1,
        "U":  jax.random.normal(ku,  (F, H), jnp.float32) * 0.1,
        "bU": jax.random.normal(kbu, (1, H), jnp.float32) * 0.1,
        "V":  jax.random.normal(kv,  (H, 1), jnp.float32) * 0.1,
        "bV": jax.random.normal(kbv, (1, 1), jnp.float32) * 0.1,
    }

    # All-valid mask: finite output, direct comparison against the full-path
    # reference (validates that the elided score path is output-identical).
    out = jax.block_until_ready(glu_pooling(features, attention_mask, params))
    ref = glu_pooling_ref(features, attention_mask, params)
    assert out.shape == (B, F)
    assert jnp.allclose(out, ref, atol=1e-4, rtol=1e-4)

    # Partially masked batch: the literal size-1 softmax turns masked rows
    # into NaN exactly as the PyTorch reference does; NaN patterns must match.
    masked = attention_mask.at[1, 4:].set(0.0)
    out_m = jax.block_until_ready(glu_pooling(features, masked, params))
    ref_m = glu_pooling_ref(features, masked, params)
    assert jnp.allclose(out_m, ref_m, atol=1e-4, rtol=1e-4, equal_nan=True)

    print("KERNEL_OK")
</pallas_src>

<mosaic_0001>
module attributes {stable_mosaic.version = 11 : i64} {
  func.func @glu_pooling_kernel(%arg0: i32, %arg1: i32, %arg2: memref<1x8x128xf32, #tpu.memory_space<vmem>>, %arg3: memref<1x1x8xf32, #tpu.memory_space<vmem>>, %arg4: memref<1x1x128xf32, #tpu.memory_space<vmem>>, %arg5: memref<1x1x128xf32, #tpu.memory_space<vmem>>) attributes {dimension_semantics = [#tpu.dimension_semantics<parallel>, #tpu.dimension_semantics<arbitrary>], iteration_bounds = array<i64: 2, 1>, scalar_prefetch = 0 : i64, scratch_operands = 1 : i64, tpu.core_type = #tpu.core_type<tc>, window_params = [{transform_indices = @transform_0, window_bounds = array<i64: 1, 8, 128>}, {transform_indices = @transform_1, window_bounds = array<i64: 1, 1, 8>}, {transform_indices = @transform_2, window_bounds = array<i64: 1, 1, 128>}]} {
    %c0_i32 = arith.constant 0 : i32
    %0 = arith.cmpi eq, %arg1, %c0_i32 : i32
    %1 = arith.extui %0 : i1 to i32
    %c0_i32_0 = arith.constant 0 : i32
    %2 = arith.cmpi ne, %1, %c0_i32_0 : i32
    scf.if %2 {
      %cst_16 = arith.constant 0.000000e+00 : f32
      %20 = vector.broadcast %cst_16 : f32 to vector<1x1x128xf32>
      %c0_17 = arith.constant 0 : index
      %c0_18 = arith.constant 0 : index
      %c0_19 = arith.constant 0 : index
      %21 = vector.load %arg5[%c0_17, %c0_18, %c0_19] : memref<1x1x128xf32, #tpu.memory_space<vmem>>, vector<1x1x128xf32>
      tpu.vector_store %arg5[%c0_17, %c0_18, %c0_19], %20 {strides = array<i32>} : memref<1x1x128xf32, #tpu.memory_space<vmem>>, vector<1x1x128xf32>,
    } else {
    }
    %c0 = arith.constant 0 : index
    %c0_1 = arith.constant 0 : index
    %c0_2 = arith.constant 0 : index
    %3 = vector.load %arg3[%c0, %c0_1, %c0_2] : memref<1x1x8xf32, #tpu.memory_space<vmem>>, vector<1x1x8xf32>
    %cst = arith.constant 0.000000e+00 : f32
    %4 = vector.broadcast %cst : f32 to vector<1x1x8xf32>
    %5 = arith.cmpf oeq, %3, %4 : vector<1x1x8xf32>
    %cst_3 = arith.constant 0x7FC00000 : f32
    %6 = vector.broadcast %cst_3 : f32 to vector<1x1x8xf32>
    %7 = arith.select %5, %6, %3 : vector<1x1x8xi1>, vector<1x1x8xf32>
    %8 = tpu.transpose %7, [0, 2, 1] : vector<1x1x8xf32> -> vector<1x8x1xf32>
    %c0_4 = arith.constant 0 : index
    %c0_5 = arith.constant 0 : index
    %c0_6 = arith.constant 0 : index
    %9 = vector.load %arg2[%c0_4, %c0_5, %c0_6] : memref<1x8x128xf32, #tpu.memory_space<vmem>>, vector<1x8x128xf32>
    %c0_7 = arith.constant 0 : index
    %c0_8 = arith.constant 0 : index
    %c0_9 = arith.constant 0 : index
    %10 = vector.load %arg5[%c0_7, %c0_8, %c0_9] : memref<1x1x128xf32, #tpu.memory_space<vmem>>, vector<1x1x128xf32>
    %11 = vector.broadcast %8 : vector<1x8x1xf32> to vector<1x8x128xf32>
    %12 = arith.mulf %11, %9 : vector<1x8x128xf32>
    %cst_10 = arith.constant dense<0.000000e+00> : vector<1x128xf32>
    %13 = vector.multi_reduction <add>, %12, %cst_10 [1] : vector<1x8x128xf32> to vector<1x128xf32>
    %14 = vector.shape_cast %13 : vector<1x128xf32> to vector<1x1x128xf32>
    %15 = arith.addf %10, %14 : vector<1x1x128xf32>
    %c0_11 = arith.constant 0 : index
    %c0_12 = arith.constant 0 : index
    %c0_13 = arith.constant 0 : index
    %16 = vector.load %arg5[%c0_11, %c0_12, %c0_13] : memref<1x1x128xf32, #tpu.memory_space<vmem>>, vector<1x1x128xf32>
    tpu.vector_store %arg5[%c0_11, %c0_12, %c0_13], %15 {strides = array<i32>} : memref<1x1x128xf32, #tpu.memory_space<vmem>>, vector<1x1x128xf32>,
    %c0_i32_14 = arith.constant 0 : i32
    %17 = arith.cmpi eq, %arg1, %c0_i32_14 : i32
    %18 = arith.extui %17 : i1 to i32
    %c0_i32_15 = arith.constant 0 : i32
    %19 = arith.cmpi ne, %18, %c0_i32_15 : i32
    scf.if %19 {
      %c0_16 = arith.constant 0 : index
      %c0_17 = arith.constant 0 : index
      %c0_18 = arith.constant 0 : index
      %20 = vector.load %arg5[%c0_16, %c0_17, %c0_18] : memref<1x1x128xf32, #tpu.memory_space<vmem>>, vector<1x1x128xf32>
      %c0_19 = arith.constant 0 : index
      %c0_20 = arith.constant 0 : index
      %c0_21 = arith.constant 0 : index
      %21 = vector.load %arg4[%c0_19, %c0_20, %c0_21] : memref<1x1x128xf32, #tpu.memory_space<vmem>>, vector<1x1x128xf32>
      tpu.vector_store %arg4[%c0_19, %c0_20, %c0_21], %20 {strides = array<i32>} : memref<1x1x128xf32, #tpu.memory_space<vmem>>, vector<1x1x128xf32>,
    } else {
    }
    return
  }
  func.func @transform_0(%arg0: i32, %arg1: i32) -> (i32, i32, i32) {
    %c0_i32 = arith.constant 0 : i32
    %c0_i32_0 = arith.constant 0 : i32
    return %arg0, %arg1, %c0_i32 : i32, i32, i32
  }
  func.func @transform_1(%arg0: i32, %arg1: i32) -> (i32, i32, i32) {
    %c0_i32 = arith.constant 0 : i32
    %c0_i32_0 = arith.constant 0 : i32
    return %arg0, %c0_i32, %arg1 : i32, i32, i32
  }
  func.func @transform_2(%arg0: i32, %arg1: i32) -> (i32, i32, i32) {
    %c0_i32 = arith.constant 0 : i32
    %c0_i32_0 = arith.constant 0 : i32
    %c0_i32_1 = arith.constant 0 : i32
    return %arg0, %c0_i32, %c0_i32_0 : i32, i32, i32
  }
}

</mosaic_0001>

<bundles_post_ra>
// kernel: tpu_custom_call.1
= control target key start
LH: loop header
LB: loop body
LE: loop exit
PB: predicated region body
PF: predicated region fallthrough
CT: control target
= control target key end

     0   :  { %7 = vsyncpa [#allocation4], 0  ;;  %s846_s0 = inlined_call_operand.hbm [shape: f32[2,8,128], index: 0, kind: input, shape index: {}]   ;;  %s847_s1 = inlined_call_operand.hbm [shape: f32[2,1,8], index: 1, kind: input, shape index: {}]   ;;  %s848_s2 = inlined_call_operand.hbm [shape: f32[2,1,128], index: 2, kind: output, shape index: {}]  }
   0x1   :  { %9 = vsyncpa [#allocation4 + $0x1], 0 }
   0x2   :  { %10 = vsyncpa [#allocation7], 0 }
   0x3   :  { %12 = vsyncpa [#allocation7 + $0x1], 0 }
   0x4   :  { %13 = vsyncpa [#allocation5], 0 }
   0x5   :  { %15 = vsyncpa [#allocation5 + $0x1], 0  ;;  %s630_s9 = smov 0   ;;  %s632_s10 = smov 0  }
   0x6   :  { %s634_s11 = smov 0   ;;  %s636_s12 = smov 0  }
   0x7   :  { %s638_s13 = smov 0   ;;  %s640_s14 = smov 0  }
   0x8 LB: > { %s380_s15 = sadd.s32 4294967295, %s608_s14   ;;  %s381_s16 = sadd.s32 4294967294, %s608_s14   ;;  %s608_s14 = sphi %s640_s14, %s21_s14   ;;  %s604_s13 = sphi %s638_s13, %s868_s13   ;;  %s600_s12 = sphi %s636_s12, %s867_s12   ;;  %s596_s11 = sphi %s634_s11, %s866_s11   ;;  %s592_s10 = sphi %s632_s10, %s865_s10   ;;  %s588_s9 = sphi %s630_s9, %s864_s9  }
   0x9   : > { %s33_s17 = sadd.s32 1, %s604_s13  ;;  %s42_s18 = sadd.s32 1, %s596_s11 }
   0xa   : > { %p35_p0 = scmp.ge.s32.totalorder %s33_s17, 2  ;;  %p49_p1 = scmp.ne.s32.totalorder %s596_s11, %s592_s10 }
   0xb   : > { %p50_p2 = scmp.eq.s32.totalorder %s608_s14, 0  ;;  %p55_p3 = scmp.ne.s32.totalorder %s592_s10, %s588_s9 }
   0xc   : > { %s870_s17 = smov (%p35_p0, %s33_s17), 0  ;;  %p56_p5 = scmp.eq.s32.totalorder %s380_s15, 0 }
   0xd   : > { %p671_p4 = por %p50_p2, %p49_p1  ;;  %s37_s20 = ssub.s32 %s604_s13, %s870_s17 }
   0xe   : > { %p107_p6 = scmp.eq.s32.totalorder %s380_s15, 1  ;;  %p40_p7 = scmp.eq.s32.totalorder %s37_s20, 0 }
   0xf   : > { %p677_p8 = por %p56_p5, %p55_p3  ;;  %p113_p10 = scmp.eq.s32.totalorder %s381_s16, 1 }
  0x10   : > { %p681_p9 = por %p107_p6, %p49_p1  ;;  %p409_p13 = scmp.lt.s32.totalorder %s608_s14, 2 }
  0x11   : > { %s852_s21 = scalar_select %p677_p8, 1, 0 }
  0x12   : > { %s853_s22 = scalar_select %p681_p9, 1, 0 }
  0x13   : > { %s686_s23 = scalar_select %p40_p7, %s596_s11, %s42_s18  }
  0x14   : > { %p688_p11 = por %p113_p10, %p55_p3  ;;  %s695_s25 = sand.u32 1, %s596_s11  }
  0x15   : > { %s384_s26 = sshll.u32 %s695_s25, 3  ;;  %s385_s27 = sshll.u32 %s604_s13, 7 }
  0x16   : > { %s854_s24 = scalar_select %p688_p11, 1, 0 }
  0x17   : > { %s702_s30 = scalar_lea.hbm %s846_s0, %s385_s27  ;;  %s137_s3 = scalar_lea.vmem [#allocation3], %s384_s26 }
  0x18   : > { %s145_s4 = sshll.u32 %s137_s3, 4  ;;  %p708_p0 = pnand %p409_p13, %p671_p4  ;;  %s704_s4 = int_to_ptr.vmem [resolvable:$true] %s145_s4 }
  0x19   : > { %s134_s6 = scalar_lea.sflag [#allocation4], %s695_s25  ;;  %s462_s7 = scalar_lea.hbm %s702_s30, 128 }
  0x1a   : > { %p463_p3 = scmp.ne.s32.totalorder %s702_s30, %s462_s7  ;;  %p464_p5 = pneg %p708_p0 }
  0x1b   : > { %s467_s16 = scalar_lea.hbm %s846_s0, 256  ;;  %p468_p4 = scmp.lt.u32.totalorder %s702_s30, %s846_s0 }
  0x1c   : > { %p465_p6 = pnand %p464_p5, %p463_p3  ;;  %p469_p10 = scmp.lt.u32.totalorder %s467_s16, %s462_s7 }
  0x1d   : > { %p471_p12 = scmp.lt.u32.totalorder %s462_s7, %s702_s30 }
  0x1e   : > { %p466_p7 = pneg %p465_p6  ;;  %p470_p13 = por %p469_p10, %p468_p4 }
  0x20   : > { %p472_p1 = por %p471_p12, %p470_p13 }
  0x22   : > { %p473_p2 = pnand %p472_p1, %p466_p7 }
  0x24   : > { %476 = shalt.err (!%p473_p2)
}
  0x25   : > { %s477_s20 = scalar_lea.vmem %s704_s4, 128  ;;  %s610_s26 = smov [#allocation3]  }
  0x26   : > { %p478_p3 = scmp.ne.s32.totalorder %s704_s4, %s477_s20  ;;  %s482_s27 = sshll.u32 %s610_s26, 4  ;;  %s483_s27 = int_to_ptr.vmem [resolvable:$false] %s482_s27 }
  0x27   : > { %s484_s28 = scalar_lea.vmem %s483_s27, 256  ;;  %p485_p9 = scmp.lt.s32.totalorder %s704_s4, %s483_s27 }
  0x28   : > { %p480_p6 = pnand %p478_p3, %p464_p5  ;;  %p486_p4 = scmp.lt.s32.totalorder %s484_s28, %s477_s20 }
  0x2a   : > { %p481_p11 = pneg %p480_p6  ;;  %p487_p10 = por %p486_p4, %p485_p9 }
  0x2c   : > { %p488_p12 = pnand %p487_p10, %p481_p11 }
  0x2e   : > { %491 = shalt.err (!%p488_p12)
}
  0x2f   : > { %401 = dma.hbm_to_vmem [thread:$0]  (!%p708_p0), %s702_s30, 128, %s704_s4, %s134_s6  }
  0x30   : > { %p856_p1 = scmp.lt.s32.totalorder %s608_s14, 3  ;;  %p857_p2 = scmp.ge.s32.totalorder %s608_s14, 1 }
  0x31   : > { %s386_s3 = sshll.u32 %s604_s13, 4  ;;  %s155_s7 = scalar_lea.vmem [#allocation6], %s695_s25 }
  0x32   : > { %p744_p7 = pnand %p857_p2, %p856_p1  ;;  %s163_s8 = sshll.u32 %s155_s7, 4  ;;  %s164_s8 = int_to_ptr.vmem [resolvable:$true] %s163_s8 }
  0x33   : > { %s753_s18 = scalar_lea.hbm %s847_s1, %s386_s3  ;;  %s153_s30 = scalar_lea.sflag [#allocation7], %s695_s25 }
  0x34   : > { %s858_s29 = scalar_select %p744_p7, 1, 0 }
  0x35   : > { %s492_s4 = scalar_lea.hbm %s753_s18, 16  ;;  %s497_s20 = scalar_lea.hbm %s847_s1, 32 }
  0x36   : > { %p493_p9 = scmp.ne.s32.totalorder %s753_s18, %s492_s4  ;;  %p498_p3 = scmp.lt.u32.totalorder %s753_s18, %s847_s1 }
  0x37   : > { %p499_p6 = scmp.lt.u32.totalorder %s497_s20, %s492_s4  ;;  %p501_p10 = scmp.lt.u32.totalorder %s492_s4, %s753_s18 }
  0x38   : > { %p495_p11 = pnand %p493_p9, %p464_p5 }
  0x39   : > { %p500_p4 = por %p499_p6, %p498_p3 }
  0x3a   : > { %p496_p13 = pneg %p495_p11 }
  0x3b   : > { %p502_p12 = por %p501_p10, %p500_p4 }
  0x3d   : > { %p503_p1 = pnand %p502_p12, %p496_p13 }
  0x3f   : > { %506 = shalt.err (!%p503_p1)
}
  0x40   : > { %s507_s25 = scalar_lea.vmem %s164_s8, 16  ;;  %s611_s28 = smov [#allocation6]  }
  0x41   : > { %p508_p2 = scmp.ne.s32.totalorder %s164_s8, %s507_s25  ;;  %s512_s3 = sshll.u32 %s611_s28, 4  ;;  %s513_s3 = int_to_ptr.vmem [resolvable:$false] %s512_s3 }
  0x42   : > { %s514_s7 = scalar_lea.vmem %s513_s3, 32  ;;  %p515_p8 = scmp.lt.s32.totalorder %s164_s8, %s513_s3 }
  0x43   : > { %p510_p9 = pnand %p508_p2, %p464_p5  ;;  %p516_p7 = scmp.lt.s32.totalorder %s514_s7, %s507_s25 }
  0x45   : > { %p511_p11 = pneg %p510_p9  ;;  %p517_p3 = por %p516_p7, %p515_p8 }
  0x47   : > { %p518_p6 = pnand %p517_p3, %p511_p11 }
  0x49   : > { %521 = shalt.err (!%p518_p6)
}
  0x4a   : > { %404 = dma.hbm_to_vmem [thread:$0]  (!%p708_p0), %s753_s18, 16, %s164_s8, %s153_s30  }
  0x4b   : > { %p859_p13 = scmp.ne.s32.totalorder %s858_s29, 0 }
  0x4c   : > { %s778_s15 = sand.u32 (!%p859_p13), 1, %s592_s10   ;;  %p860_p5 = scmp.ne.s32.totalorder (!%p859_p13), %s852_s21, 0 }
  0x4d   : > { %172 = sbr.rel (%p859_p13) target bundleno = 385 (0x181), region = 28  ;;  %s388_s16 = sshll.u32 (!%p859_p13), %s778_s15, 3 }
  0x4e   : > { %s175_s4 = scalar_lea.sflag (!%p859_p13), [#allocation4], %s778_s15  ;;  %s178_s6 = scalar_lea.vmem (!%p859_p13), [#allocation3], %s388_s16 }
  0x54   : > { %575 = dma.done.wait (%p860_p5), %s175_s4, 128  }
  0x55   : > { %577 = vsyncadd (%p860_p5), %s175_s4, 4294967168  ;;  %s184_s5 = scalar_lea.sflag [#allocation7], %s778_s15  ;;  %s186_s29 = scalar_lea.vmem [#allocation6], %s778_s15 }
  0x56   : > { %579 = dma.done.wait (%p860_p5), %s184_s5, 16  }
  0x57   : > { %581 = vsyncadd (%p860_p5), %s184_s5, 4294967280  ;;  %v612_v0 = vmov 0.0   ;;  %v215_v1 = vld [vmem:[%s186_s29] sm:$0x1]  ;;  %v613_v3 = vmov 0   ;;  %v250_v5 = vld [vmem:[%s178_s6] sm:$0xff] }
  0x58   : > { %214 = vst [vmem:[#allocation2] sm:$0x1] %v612_v0  ;;  %vm216_vm0 = vcmp.eq.f32.partialorder %v215_v1, 0.0  ;;  %s389_s21 = sshll.u32 %s600_s12, 4  ;;  %s209_s8 = scalar_lea.vmem [#allocation8], %s778_s15 }
  0x59   : > { %v217_v2 = vsel %vm216_vm0, nan, %v215_v1  ;;  %s284_s18 = sshll.u32 %s209_s8, 4  ;;  %s797_s20 = scalar_lea.hbm %s848_s2, %s389_s21  ;;  %s799_s18 = int_to_ptr.vmem [resolvable:$true] %s284_s18 }
  0x5a   : > { %218 = vxpose.xlu0.b32.start.end [1/1] (short) (narrow) %v217_v2, 8  ;;  %s272_s26 = scalar_lea.sflag [#allocation5], %s778_s15  ;;  %s522_s27 = scalar_lea.vmem %s799_s18, 16 }
  0x5b   : > { %p523_p8 = scmp.ne.s32.totalorder %s799_s18, %s522_s27  ;;  %p861_p0 = scmp.ne.s32.totalorder %s853_s22, 0 }
  0x5c   : > { %s614_s12 = smov [#allocation8]  }
  0x5d   : > { %p524_p7 = pnand %p523_p8, %p861_p0  ;;  %s526_s25 = sshll.u32 %s614_s12, 4  ;;  %s527_s25 = int_to_ptr.vmem [resolvable:$false] %s526_s25 }
  0x5e   : > { %s528_s28 = scalar_lea.vmem %s527_s25, 32  ;;  %p529_p10 = scmp.lt.s32.totalorder %s799_s18, %s527_s25 }
  0x5f   : > { %v251_v13 = vld [vmem:[#allocation2] sm:$0x1]  ;;  %p525_p4 = pneg %p524_p7  ;;  %p530_p12 = scmp.lt.s32.totalorder %s528_s28, %s522_s27 }
  0x61   : > { %p531_p1 = por %p530_p12, %p529_p10 }
  0x63   : > { %p532_p2 = pnand %p531_p1, %p525_p4 }
  0x83   : > { %461 = vset.pattern.permute.xlu0 %v613_v3 }
  0xda   : > { %v234_v4 = vpop.trf.xlu0 }
  0xdb   : > { %254 = vperm.xlu0 %461, %v234_v4  }
 0x15a   : > { %v255_v6 = vpop.permute.xlu0 %254 }
 0x15b   : > { %v257_v7 = vmul.f32 %v255_v6, %v250_v5 }
 0x15d   : > { %v258_v8 = vrot.slane %v257_v7, 4 }
 0x15f   : > { %v259_v9 = vadd.f32 %v258_v8, %v257_v7 }
 0x161   : > { %v260_v10 = vrot.slane %v259_v9, 2 }
 0x163   : > { %v261_v11 = vadd.f32 %v260_v10, %v259_v9 }
 0x165   : > { %v262_v12 = vrot.slane %v261_v11, 1 }
 0x167   : > { %v263_v14 = vadd.f32 %v262_v12, %v261_v11 }
 0x169   : > { %v264_v15 = vadd.f32 %v263_v14, %v251_v13 }
 0x16b   : > { %265 = vst [vmem:[#allocation2] sm:$0x1] %v264_v15 }
 0x172   : > { %v269_v16 = vld [vmem:[#allocation2] sm:$0x1] }
 0x173   : > { %270 = vst [vmem:[%s209_s8] sm:$0x1] %v269_v16 }
 0x174   : > { %535 = shalt.err (!%p532_p2)
}
 0x175   : > { %s536_s3 = scalar_lea.hbm %s797_s20, 16  ;;  %s540_s16 = scalar_lea.hbm %s848_s2, 32 }
 0x176   : > { %p537_p9 = scmp.ne.s32.totalorder %s797_s20, %s536_s3  ;;  %p541_p6 = scmp.lt.u32.totalorder %s797_s20, %s848_s2 }
 0x177   : > { %p542_p13 = scmp.lt.u32.totalorder %s540_s16, %s536_s3  ;;  %p544_p8 = scmp.lt.u32.totalorder %s536_s3, %s797_s20 }
 0x178   : > { %p538_p11 = pnand %p537_p9, %p861_p0 }
 0x179   : > { %p543_p5 = por %p542_p13, %p541_p6 }
 0x17a   : > { %p539_p3 = pneg %p538_p11 }
 0x17b   : > { %p545_p7 = por %p544_p8, %p543_p5 }
 0x17d   : > { %p546_p4 = pnand %p545_p7, %p539_p3 }
 0x17f   : > { %549 = shalt.err (!%p546_p4)
}
 0x180   : > { %396 = dma.vmem_to_hbm [thread:$0]  (%p861_p0), %s799_s18, 16, %s797_s20, %s272_s26  }
 0x181 PF: > { %s296_s5 = sand.u32 1, %s588_s9   ;;  %p862_p10 = scmp.ne.s32.totalorder %s854_s24, 0 }
 0x182   : > { %p863_p12 = scmp.ge.s32.totalorder %s608_s14, 2  ;;  %s297_s29 = scalar_lea.sflag [#allocation5], %s296_s5 }
 0x184   : > { %p406_p1 = pnand %p863_p12, %p862_p10 }
 0x186   : > { %583 = dma.done.wait (!%p406_p1), %s297_s29, 16  }
 0x187   : > { %585 = vsyncadd (!%p406_p1), %s297_s29, 4294967280  ;;  %s21_s14 = sadd.s32 1, %s608_s14   ;;  %s864_s9 = smov %s592_s10 }
 0x188   : > { %p18_p2 = scmp.ge.s32.totalorder %s21_s14, 4   ;;  %s865_s10 = smov %s596_s11 }
 0x189   : > { %s866_s11 = smov %s686_s23  ;;  %s867_s12 = smov %s604_s13 }
 0x18a   : > { %s868_s13 = smov %s870_s17  ;;  %20 = sbr.rel (!%p18_p2) target bundleno = 8 (0x8), region = 94 }
 0x191   :  { %301 = vsyncpa [#allocation4], 1 }
 0x192   :  { %303 = vsyncpa [#allocation4 + $0x1], 1 }
 0x193   :  { %304 = vsyncpa [#allocation7], 1 }
 0x194   :  { %306 = vsyncpa [#allocation7 + $0x1], 1 }
 0x195   :  { %307 = vsyncpa [#allocation5], 1 }
 0x196   :  { %309 = vsyncpa [#allocation5 + $0x1], 1 }

</bundles_post_ra>
